<compile_context>
chip_gen: v7x
topology: tpu7x:2x2x1
jax: 0.10.0
libtpu: 0.0.40
codegen_flags: <defaults>
</compile_context>

<pallas_src>
import functools

import jax
import jax.numpy as jnp
from jax.experimental import pallas as pl
from jax.experimental.pallas import tpu as pltpu


def _sine_activation_kernel(tau_ref, w_ref, b_ref, o_ref, *, half_features):
    tau = tau_ref[...]          # (TB, K)      float32
    w = w_ref[...]              # (K, 2F)      float32, resident across grid steps
    b = b_ref[...]              # (1, 2F)      float32, resident across grid steps

    tb = tau.shape[0]
    k_dim = tau.shape[1]
    two_f = w.shape[1]

    if k_dim <= 8:
        # K is tiny: a K-step VPU broadcast-multiply-accumulate beats a (K x 128/256) MXU push.
        acc = jnp.broadcast_to(b, (tb, two_f)).astype(jnp.float32)   # bias hoisted, done once
        for k in range(k_dim):                                       # static unroll (K small)
            acc = acc + tau[:, k:k + 1] * w[k:k + 1, :]
    else:
        acc = jnp.dot(tau, w, preferred_element_type=jnp.float32) + b

    # Masked sine: first `half_features` lanes get sin(), second half passes through.
    col = jax.lax.broadcasted_iota(jnp.int32, acc.shape, dimension=1)
    out = jnp.where(col < half_features, jnp.sin(acc), acc)
    o_ref[...] = out.astype(o_ref.dtype)


def sine_activation(tau, weight_linear, bias_linear, weight_periodic, bias_periodic,
                    *, block_rows=1024):
    """tau: (B, in_features) -> (B, 2*output_features), float32."""
    B, in_features = tau.shape
    out_features = weight_linear.shape[1]
    two_f = 2 * out_features

    # Fuse the two projections: one weight (K, 2F) and one bias (1, 2F).
    w_cat = jnp.concatenate([weight_linear, weight_periodic], axis=1).astype(jnp.float32)
    b_cat = jnp.concatenate(
        [bias_linear.reshape(1, out_features), bias_periodic.reshape(1, out_features)],
        axis=1,
    ).astype(jnp.float32)

    # Batch tile: multiple of 8 sublanes, sized well under VMEM even on v7x (64 MiB phys).
    def round_up(x, m):
        return ((x + m - 1) // m) * m

    tb = min(round_up(block_rows, 8), round_up(B, 8))
    b_pad = round_up(B, tb)
    tau_p = tau.astype(jnp.float32)
    if b_pad != B:
        tau_p = jnp.pad(tau_p, ((0, b_pad - B), (0, 0)))

    grid = (b_pad // tb,)

    kernel = functools.partial(_sine_activation_kernel, half_features=out_features)

    cost = pl.CostEstimate(
        flops=2 * b_pad * in_features * two_f,
        transcendentals=b_pad * out_features,
        bytes_accessed=4 * (b_pad * in_features + in_features * two_f + two_f + b_pad * two_f),
    )

    out = pl.pallas_call(
        kernel,
        out_shape=jax.ShapeDtypeStruct((b_pad, two_f), jnp.float32),
        grid=grid,
        in_specs=[
            pl.BlockSpec((tb, in_features), lambda i: (i, 0)),   # tau tile, pipelined over batch
            pl.BlockSpec((in_features, two_f), lambda i: (0, 0)),  # fused weights, resident
            pl.BlockSpec((1, two_f), lambda i: (0, 0)),            # fused bias, resident
        ],
        out_specs=pl.BlockSpec((tb, two_f), lambda i: (i, 0)),
        compiler_params=pltpu.CompilerParams(
            dimension_semantics=("parallel",),
            vmem_limit_bytes=32 * 1024 * 1024,
        ),
        cost_estimate=cost,
    )(tau_p, w_cat, b_cat)

    if b_pad != B:
        out = out[:B]
    return out
    # TODO(synk): output lane width is 2*out_features (=64 here), below 128 -> masked stores;
    # not padded because the module's output width is fixed by the API.


def sine_activation_ref(tau, wl, bl, wp, bp):
    v1 = jnp.sin(tau @ wl + bl)
    v2 = tau @ wp + bp
    return jnp.concatenate([v1, v2], axis=-1)


if __name__ == "__main__":
    in_features = 4
    output_features = 32
    batch = 8

    key = jax.random.PRNGKey(0)
    k_tau, k_wl, k_bl, k_wp, k_bp = jax.random.split(key, 5)

    tau = jax.random.normal(k_tau, (batch, in_features), dtype=jnp.float32)
    weight_linear = jax.random.normal(k_wl, (in_features, output_features), dtype=jnp.float32)
    bias_linear = jax.random.normal(k_bl, (output_features,), dtype=jnp.float32)
    weight_periodic = jax.random.normal(k_wp, (in_features, output_features), dtype=jnp.float32)
    bias_periodic = jax.random.normal(k_bp, (output_features,), dtype=jnp.float32)

    out = sine_activation(tau, weight_linear, bias_linear, weight_periodic, bias_periodic)
    out = jax.block_until_ready(out)

    ref = sine_activation_ref(tau, weight_linear, bias_linear, weight_periodic, bias_periodic)
    assert out.shape == (batch, 2 * output_features)
    assert jnp.allclose(out, ref, atol=1e-5, rtol=1e-5)

    print("KERNEL_OK")
</pallas_src>

<mosaic_0001>
module attributes {stable_mosaic.version = 11 : i64} {
  func.func @_sine_activation_kernel(%arg0: i32, %arg1: memref<8x4xf32, #tpu.memory_space<vmem>>, %arg2: memref<4x64xf32, #tpu.memory_space<vmem>>, %arg3: memref<1x64xf32, #tpu.memory_space<vmem>>, %arg4: memref<8x64xf32, #tpu.memory_space<vmem>>) attributes {dimension_semantics = [#tpu.dimension_semantics<parallel>], iteration_bounds = array<i64: 1>, scalar_prefetch = 0 : i64, scratch_operands = 0 : i64, tpu.core_type = #tpu.core_type<tc>, window_params = [{transform_indices = @transform_0, window_bounds = array<i64: 8, 4>}, {pipeline_mode = #tpu.pipeline_mode<synchronous>, transform_indices = @transform_1, window_bounds = array<i64: 4, 64>}, {pipeline_mode = #tpu.pipeline_mode<synchronous>, transform_indices = @transform_2, window_bounds = array<i64: 1, 64>}, {transform_indices = @transform_3, window_bounds = array<i64: 8, 64>}]} {
    %c0 = arith.constant 0 : index
    %c0_0 = arith.constant 0 : index
    %0 = vector.load %arg1[%c0, %c0_0] : memref<8x4xf32, #tpu.memory_space<vmem>>, vector<8x4xf32>
    %c0_1 = arith.constant 0 : index
    %c0_2 = arith.constant 0 : index
    %1 = vector.load %arg2[%c0_1, %c0_2] : memref<4x64xf32, #tpu.memory_space<vmem>>, vector<4x64xf32>
    %c0_3 = arith.constant 0 : index
    %c0_4 = arith.constant 0 : index
    %2 = vector.load %arg3[%c0_3, %c0_4] : memref<1x64xf32, #tpu.memory_space<vmem>>, vector<1x64xf32>
    %3 = vector.shape_cast %2 : vector<1x64xf32> to vector<1x64xf32>
    %4 = vector.broadcast %3 : vector<1x64xf32> to vector<8x64xf32>
    %5 = vector.extract_strided_slice %0 {offsets = [0, 0], sizes = [8, 1], strides = [1, 1]} : vector<8x4xf32> to vector<8x1xf32>
    %6 = vector.extract_strided_slice %1 {offsets = [0, 0], sizes = [1, 64], strides = [1, 1]} : vector<4x64xf32> to vector<1x64xf32>
    %7 = vector.broadcast %5 : vector<8x1xf32> to vector<8x64xf32>
    %8 = vector.broadcast %6 : vector<1x64xf32> to vector<8x64xf32>
    %9 = arith.mulf %7, %8 : vector<8x64xf32>
    %10 = arith.addf %4, %9 : vector<8x64xf32>
    %11 = vector.extract_strided_slice %0 {offsets = [0, 1], sizes = [8, 1], strides = [1, 1]} : vector<8x4xf32> to vector<8x1xf32>
    %12 = vector.extract_strided_slice %1 {offsets = [1, 0], sizes = [1, 64], strides = [1, 1]} : vector<4x64xf32> to vector<1x64xf32>
    %13 = vector.broadcast %11 : vector<8x1xf32> to vector<8x64xf32>
    %14 = vector.broadcast %12 : vector<1x64xf32> to vector<8x64xf32>
    %15 = arith.mulf %13, %14 : vector<8x64xf32>
    %16 = arith.addf %10, %15 : vector<8x64xf32>
    %17 = vector.extract_strided_slice %0 {offsets = [0, 2], sizes = [8, 1], strides = [1, 1]} : vector<8x4xf32> to vector<8x1xf32>
    %18 = vector.extract_strided_slice %1 {offsets = [2, 0], sizes = [1, 64], strides = [1, 1]} : vector<4x64xf32> to vector<1x64xf32>
    %19 = vector.broadcast %17 : vector<8x1xf32> to vector<8x64xf32>
    %20 = vector.broadcast %18 : vector<1x64xf32> to vector<8x64xf32>
    %21 = arith.mulf %19, %20 : vector<8x64xf32>
    %22 = arith.addf %16, %21 : vector<8x64xf32>
    %23 = vector.extract_strided_slice %0 {offsets = [0, 3], sizes = [8, 1], strides = [1, 1]} : vector<8x4xf32> to vector<8x1xf32>
    %24 = vector.extract_strided_slice %1 {offsets = [3, 0], sizes = [1, 64], strides = [1, 1]} : vector<4x64xf32> to vector<1x64xf32>
    %25 = vector.broadcast %23 : vector<8x1xf32> to vector<8x64xf32>
    %26 = vector.broadcast %24 : vector<1x64xf32> to vector<8x64xf32>
    %27 = arith.mulf %25, %26 : vector<8x64xf32>
    %28 = arith.addf %22, %27 : vector<8x64xf32>
    %29 = tpu.iota {dimensions = array<i32: 1>} : vector<8x64xi32>
    %c32_i32 = arith.constant 32 : i32
    %30 = vector.broadcast %c32_i32 : i32 to vector<8x64xi32>
    %31 = arith.cmpi slt, %29, %30 : vector<8x64xi32>
    %32 = math.sin %28 : vector<8x64xf32>
    %33 = arith.select %31, %32, %28 : vector<8x64xi1>, vector<8x64xf32>
    %c0_5 = arith.constant 0 : index
    %c0_6 = arith.constant 0 : index
    %34 = vector.load %arg4[%c0_5, %c0_6] : memref<8x64xf32, #tpu.memory_space<vmem>>, vector<8x64xf32>
    tpu.vector_store %arg4[%c0_5, %c0_6], %33 {strides = array<i32>} : memref<8x64xf32, #tpu.memory_space<vmem>>, vector<8x64xf32>,
    return
  }
  func.func @transform_0(%arg0: i32) -> (i32, i32) {
    %c0_i32 = arith.constant 0 : i32
    %c0_i32_0 = arith.constant 0 : i32
    return %arg0, %c0_i32 : i32, i32
  }
  func.func @transform_1(%arg0: i32) -> (i32, i32) {
    %c0_i32 = arith.constant 0 : i32
    %c0_i32_0 = arith.constant 0 : i32
    %c0_i32_1 = arith.constant 0 : i32
    return %c0_i32, %c0_i32_0 : i32, i32
  }
  func.func @transform_2(%arg0: i32) -> (i32, i32) {
    %c0_i32 = arith.constant 0 : i32
    %c0_i32_0 = arith.constant 0 : i32
    %c0_i32_1 = arith.constant 0 : i32
    return %c0_i32, %c0_i32_0 : i32, i32
  }
  func.func @transform_3(%arg0: i32) -> (i32, i32) {
    %c0_i32 = arith.constant 0 : i32
    %c0_i32_0 = arith.constant 0 : i32
    return %arg0, %c0_i32 : i32, i32
  }
}

</mosaic_0001>

<bundles_post_ra>
// kernel: tpu_custom_call.1
= control target key start
LH: loop header
LB: loop body
LE: loop exit
PB: predicated region body
PF: predicated region fallthrough
CT: control target
= control target key end

     0   :  { %v242_v1 = vmov 0   ;;  %v243_v2 = vmov 2   ;;  %s318_s0 = inlined_call_operand.vmem [shape: f32[8,4], index: 0, kind: input, shape index: {}]   ;;  %s319_s1 = inlined_call_operand.vmem [shape: f32[4,64], index: 1, kind: input, shape index: {}]   ;;  %s320_s2 = inlined_call_operand.vmem [shape: f32[1,64], index: 2, kind: input, shape index: {}]   ;;  %s321_s3 = inlined_call_operand.hbm [shape: f32[8,64], index: 3, kind: output, shape index: {}]  }
   0x1   :  { %v15_v0 = vld [vmem:[%s318_s0] sm:$0xff]  ;;  %209 = vset.pattern.permute.xlu0 %v242_v1  ;;  %211 = vset.pattern.permute.xlu1 %v243_v2 }
   0x2   :  { %8 = vsyncpa [#allocation3], 0  ;;  %26 = vperm.xlu0 %209, %v15_v0   ;;  %46 = vperm.xlu1 %211, %v15_v0   ;;  %v244_v3 = vmov 1   ;;  %v245_v4 = vmov 3   ;;  %v29_v5 = vlaneseq  ;;  %v16_v8 = vld [vmem:[%s319_s1] sm:$0xf] }
   0x3   :  { %v189_v17 = vld [vmem:[%s320_s2] ss:$0 sm:$0xff]  ;;  %v246_v39 = vmov 683565275   ;;  %v247_v41 = vmov 2475754826  }
   0x4   :  { %v30_v6 = vshrl.u32 %v29_v5, 7  ;;  %v248_v44 = vmov 2131351028   ;;  %v249_v47 = vmov 2102212464   ;;  %s252_s1 = smov [#allocation2]  }
   0x5   :  { %v250_v50 = vmov 920167782   ;;  %v251_v53 = vmov 1326507024   ;;  %s181_s2 = sshll.u32 %s252_s1, 4  ;;  %vm173_vm14 = vcmask 523264   ;;  %s182_s2 = int_to_ptr.vmem [resolvable:$true] %s181_s2 }
   0x6   :  { %210 = vset.pattern.permute.xlu0 %v244_v3  ;;  %212 = vset.pattern.permute.xlu1 %v245_v4  ;;  %v31_v7 = vsub.s32 0, %v30_v6  ;;  %v41_v10 = vsub.s32 1, %v30_v6  ;;  %v51_v12 = vsub.s32 2, %v30_v6  ;;  %v61_v14 = vsub.s32 3, %v30_v6  ;;  %s218_s17 = scalar_lea.vmem %s182_s2, 128  ;;  %p223_p1 = scmp.lt.s32.totalorder %s182_s2, %s182_s2 }
   0x7   :  { %36 = vperm.xlu0 %210, %v15_v0   ;;  %56 = vperm.xlu1 %212, %v15_v0   ;;  %p219_p0 = scmp.ne.s32.totalorder %s182_s2, %s218_s17  ;;  %p224_p2 = scmp.lt.s32.totalorder %s218_s17, %s218_s17 }
   0x8   :  { %v32_v9 = vrot.slane %v16_v8, %v31_v7  ;;  %v42_v16 = vrot.slane %v16_v8, %v41_v10  ;;  %v52_v18 = vrot.slane %v16_v8, %v51_v12  ;;  %v62_v19 = vrot.slane %v16_v8, %v61_v14 }
   0x9   :  { %p225_p3 = por %p224_p2, %p223_p1 }
   0xb   :  { %213 = vset.pattern.permute.xlu0 %v245_v4  ;;  %p226_p4 = pnand %p225_p3, %p219_p0 }
  0x81   :  { %v27_v11 = vpop.permute.xlu0 %26  ;;  %v47_v13 = vpop.permute.xlu1 %46 }
  0x82   :  { %v33_v15 = vmul.f32 %v32_v9, %v27_v11  ;;  %v53_v24 = vmul.f32 %v52_v18, %v47_v13 }
  0x84   :  { %v34_v22 = vadd.f32 %v189_v17, %v33_v15 }
  0x86   :  { %v37_v20 = vpop.permute.xlu0 %36  ;;  %v57_v21 = vpop.permute.xlu1 %56 }
  0x87   :  { %v43_v23 = vmul.f32 %v42_v16, %v37_v20  ;;  %v63_v26 = vmul.f32 %v62_v19, %v57_v21 }
  0x89   :  { %v44_v25 = vadd.f32 %v43_v23, %v34_v22 }
  0x8b   :  { %v54_v27 = vadd.f32 %v53_v24, %v44_v25 }
  0x8d   :  { %v283_v28 = vadd.f32 %v63_v26, %v54_v27 }
  0x8f   :  { %v71_v29 = vand.u32 2139095040, %v283_v28  ;;  %v68_v33 = vand.u32 2147483647, %v283_v28  ;;  %vm70_vm7 = vcmp.lt.s32.totalorder %v283_v28, 0  ;;  %vm160_vm13 = vweird.f32 %v283_v28 }
  0x91   :  { %v72_v30 = vshrl.u32 %v71_v29, 23  ;;  %v75_v37 = vand.u32 8388607, %v68_v33  ;;  %vm69_vm8 = vcmp.le.f32.partialorder %v68_v33, 0.7853982 }
  0x93   :  { %v190_v31 = vadd.s32 4294967169, %v72_v30  ;;  %v76_v55 = vor.u32 8388608, %v75_v37 }
  0x95   :  { %v78_v32 = vadd.s32 1, %v190_v31  ;;  %v116_v6 = vshll.u32 %v76_v55, 8 }
  0x97   :  { %vm79_vm0 = vcmp.gt.s32.totalorder %v78_v32, 0 }
  0x98   :  { %v80_v34 = vsel %vm79_vm0, %v78_v32, 0 }
  0x99   :  { %v82_v35 = vand.u32 31, %v80_v34  ;;  %v81_v38 = vshrl.u32 %v80_v34, 5 }
  0x9b   :  { %v83_v36 = vsub.s32 32, %v82_v35  ;;  %v85_v40 = vshll.u32 %v246_v39, %v82_v35  ;;  %v88_v42 = vshll.u32 %v247_v41, %v82_v35  ;;  %v91_v46 = vshll.u32 %v248_v44, %v82_v35 }
  0x9c   :  { %v94_v49 = vshll.u32 %v249_v47, %v82_v35  ;;  %v97_v52 = vshll.u32 %v250_v50, %v82_v35  ;;  %vm100_vm1 = vcmp.lt.s32.totalorder %v81_v38, 1  ;;  %vm103_vm2 = vcmp.lt.s32.totalorder %v81_v38, 4 }
  0x9d   :  { %v86_v43 = vshrl.u32 %v247_v41, %v83_v36  ;;  %v89_v45 = vshrl.u32 %v248_v44, %v83_v36  ;;  %v92_v48 = vshrl.u32 %v249_v47, %v83_v36  ;;  %v95_v51 = vshrl.u32 %v250_v50, %v83_v36 }
  0x9e   :  { %v98_v54 = vshrl.u32 %v251_v53, %v83_v36  ;;  %v84_v0 = vshrl.u32 %v246_v39, %v83_v36  ;;  %vm102_vm3 = vcmp.lt.s32.totalorder %v81_v38, 3  ;;  %vm101_vm4 = vcmp.lt.s32.totalorder %v81_v38, 2 }
  0x9f   :  { %v87_v56 = vor.u32 %v86_v43, %v85_v40  ;;  %v90_v57 = vor.u32 %v89_v45, %v88_v42  ;;  %v93_v58 = vor.u32 %v92_v48, %v91_v46  ;;  %v96_v59 = vor.u32 %v95_v51, %v94_v49 }
  0xa0   :  { %v99_v60 = vor.u32 %v98_v54, %v97_v52  ;;  %v66_v52 = vand.u32 127, %v29_v5 }
  0xa1   :  { %v105_v61 = vsel %vm103_vm2, %v93_v58, 2102212464  ;;  %v108_v62 = vsel %vm100_vm1, %v87_v56, %v90_v57  ;;  %v112_v63 = vsel %vm100_vm1, %v90_v57, %v93_v58  ;;  %v109_v1 = vsel %vm103_vm2, %v96_v59, 920167782 }
  0xa2   :  { %v113_v2 = vsel %vm103_vm2, %v99_v60, 1326507024  ;;  %v110_v3 = vsel %vm102_vm3, %v93_v58, %v109_v1  ;;  %v104_v7 = vsel %vm100_vm1, %v84_v0, %v87_v56  ;;  %v106_v8 = vsel %vm102_vm3, %v90_v57, %v105_v61 }
  0xa3   :  { %v114_v4 = vsel %vm102_vm3, %v96_v59, %v113_v2  ;;  %v111_v9 = vsel %vm101_vm4, %v108_v62, %v110_v3  ;;  %v107_v15 = vsel %vm101_vm4, %v104_v7, %v106_v8  ;;  %vm67_vm11 = vcmp.lt.s32.totalorder %v66_v52, 32 }
  0xa4   :  { %v115_v10 = vsel %vm101_vm4, %v112_v63, %v114_v4  ;;  %v292_v13 = vmul.u32.u64.low %v116_v6, %v111_v9  ;;  %v293_v14 = vmul.u32.u64.high %v116_v6, %v111_v9, %v292_v13  ;;  %v123_v17 = vmul.u32 %v116_v6, %v107_v15 }
  0xa5   :  { %v289_v11 = vmul.u32.u64.low %v116_v6, %v115_v10  ;;  %v290_v12 = vmul.u32.u64.high %v116_v6, %v115_v10, %v289_v11 }
  0xa6   :  { %v126_v16 = vadd.s32 1, %v293_v14 }
  0xa7   :  { %vm125_vm5 = vc.u32 %v290_v12, %v292_v13  ;;  %v124_v30 = vadd.s32 %v292_v13, %v290_v12 }
  0xa8   :  { %v127_v18 = vsel %vm125_vm5, %v126_v16, %v293_v14 }
  0xa9   :  { %v128_v19 = vadd.s32 %v127_v18, %v123_v17 }
  0xab   :  { %v129_v20 = vadd.s32 536870912, %v128_v19 }
  0xad   :  { %v130_v21 = vshrl.u32 %v129_v20, 30 }
  0xaf   :  { %v131_v22 = vshll.u32 %v130_v21, 30  ;;  %v154_v43 = vsub.s32 4, %v130_v21 }
  0xb1   :  { %v132_v23 = vsub.s32 %v128_v19, %v131_v22  ;;  %v155_v46 = vsel %vm70_vm7, %v154_v43, %v130_v21 }
  0xb2   :  { %v157_v48 = vsel %vm69_vm8, 0, %v155_v46 }
  0xb3   :  { %v134_v24 = vsub.s32 0, %v132_v23  ;;  %v161_v49 = vadd.s32 3, %v157_v48 }
  0xb5   :  { %v191_v25 = vmin.u32 %v134_v24, %v132_v23  ;;  %v162_v50 = vand.u32 3, %v161_v49 }
  0xb7   :  { %v136_v26 = vclz %v191_v25  ;;  %vm167_vm9 = vcmp.eq.s32.totalorder %v162_v50, 2  ;;  %vm164_vm10 = vcmp.eq.s32.totalorder %v162_v50, 0  ;;  %vm163_vm12 = vcmp.lt.s32.totalorder %v162_v50, 2 }
  0xb9   :  { %v192_v27 = vadd.s32 4294967294, %v136_v26 }
  0xbb   :  { %vm193_vm6 = vcmp.lt.s32.totalorder %v192_v27, 0 }
  0xbc   :  { %v139_v29 = vsel %vm193_vm6, 0, %v192_v27 }
  0xbd   :  { %v140_v31 = vsub.s32 32, %v139_v29  ;;  %v144_v32 = vsub.s32 4294967266, %v139_v29  ;;  %v141_v34 = vshll.u32 %v132_v23, %v139_v29 }
  0xbf   :  { %v142_v35 = vshrl.u32 %v124_v30, %v140_v31  ;;  %v145_v36 = vadd.s32 127, %v144_v32 }
  0xc1   :  { %v143_v37 = vor.u32 %v142_v35, %v141_v34  ;;  %v146_v38 = vshll.u32 %v145_v36, 23 }
  0xc3   :  { %v147_v39 = vor.u32 4788187, %v146_v38  ;;  %v150_v41 = vcvt.s32.f32 %v143_v37 }
  0xc5   :  { %v148_v40 = vand.u32 2147483647, %v147_v39 }
  0xc7   :  { %v151_v42 = vmul.f32 %v150_v41, %v148_v40 }
  0xc9   :  { %v152_v44 = vxor.u32 2147483648, %v151_v42 }
  0xcb   :  { %v153_v45 = vsel %vm70_vm7, %v152_v44, %v151_v42 }
  0xcc   :  { %v156_v47 = vsel %vm69_vm8, %v283_v28, %v153_v45 }
  0xcd   :  { %214 = vcosq.f32 %v156_v47 }
  0xce   :  { %216 = vsinq.f32 %v156_v47 }
  0xd7   :  { %v215_v51 = vpop.eup %214 }
  0xd8   :  { %v217_v53 = vpop.eup %216  ;;  %v168_v54 = vxor.u32 2147483648, %v215_v51 }
  0xd9   :  { %v165_v55 = vxor.u32 2147483648, %v217_v53 }
  0xda   :  { %v169_v56 = vsel %vm167_vm9, %v168_v54, %v217_v53 }
  0xdb   :  { %v166_v33 = vsel %vm164_vm10, %v215_v51, %v165_v55 }
  0xdc   :  { %v170_v57 = vsel %vm163_vm12, %v166_v33, %v169_v56 }
  0xdd   :  { %v171_v58 = vsel %vm160_vm13, nan, %v170_v57 }
  0xde   :  { %v172_v59 = vsel %vm67_vm11, %v171_v58, %v283_v28 }
  0xdf   :  { %174 = vst.msk [vmem:[#allocation2] sm:$0xff] %vm173_vm14, %v172_v59 }
  0xe0   :  { %229 = shalt.err (!%p226_p4)
}
  0xe1   :  { %s230_s20 = scalar_lea.hbm %s321_s3, 128 }
  0xe2   :  { %p231_p5 = scmp.ne.s32.totalorder %s321_s3, %s230_s20  ;;  %p234_p6 = scmp.lt.u32.totalorder %s230_s20, %s321_s3 }
  0xe4   :  { %p236_p7 = pnand %p234_p6, %p231_p5 }
  0xe6   :  { %239 = shalt.err (!%p236_p7)
}
  0xe7   :  { %184 = dma.vmem_to_hbm [thread:$0]  %s182_s2, 128, %s321_s3, [#allocation3]  }
  0xe8   :  { %240 = dma.done.wait [#allocation3], 128  }
  0xe9   :  { %241 = vsyncadd [#allocation3], 4294967168 }
  0xea   :  { %188 = vsyncpa [#allocation3], 1 }

</bundles_post_ra>
